<compile_context>
chip_gen: v7x
topology: tpu7x:2x2x1
jax: 0.10.0
libtpu: 0.0.40
codegen_flags: <defaults>
</compile_context>

<pallas_src>
import jax
import jax.numpy as jnp
from jax.experimental import pallas as pl
from jax.experimental.pallas import tpu as pltpu

_LANES = 128
_SUBLANES = 8
_VREG = _SUBLANES * _LANES          # 1024 elements = one f32 vreg
_MAX_TILE_ELEMS = 256 * 1024        # ~1 MiB f32 VMEM footprint per stream per tile
_SPLIT_THRESHOLD_ELEMS = 32 * 1024  # below this, one block (per-step overhead dominates)


def _per_atom_mae_kernel(pred_ref, target_ref, natoms_ref, out_ref):
    # |p/n - t/n| == |p - t| * (1/n): one multiply + one reciprocal instead of
    # two divides. Subtraction in the native dtype; widen only for the multiply.
    diff = jnp.abs(pred_ref[...] - target_ref[...])
    inv_n = pl.reciprocal(natoms_ref[...].astype(jnp.float32), approx=False)
    out_ref[...] = (diff.astype(jnp.float32) * inv_n).astype(out_ref.dtype)


def _pick_block(total: int, align: int, max_block: int, split_threshold: int) -> int:
    """Block length along the single grid axis (in elements of that axis).

    - Small problems: one full-extent block (full dim, so alignment not needed).
    - Larger: ~even 2-way split (rounded up to `align`) so v7x's two TCs both
      get work, capped at `max_block` (roofline-friendly tile size).
    """
    if total <= split_threshold:
        return total
    half = pl.cdiv(total, 2)
    half = pl.cdiv(half, align) * align
    return min(half, max_block)


def per_atom_mae_loss(pred: jax.Array, target: jax.Array, natoms: jax.Array) -> jax.Array:
    """JAX/Pallas equivalent of fairchem PerAtomMAELoss.forward."""
    # --- assertions mirroring the PyTorch module ---
    assert target.ndim == 1 or (target.ndim == 2 and target.shape[1] == 1), (
        "target must be (N,) or (N, 1)"
    )
    assert pred.shape == target.shape, "pred and target must have the same shape"

    out_dtype = jnp.result_type(pred.dtype, target.dtype)
    if not jnp.issubdtype(out_dtype, jnp.floating):
        out_dtype = jnp.float32

    n = int(target.size)

    # Pick a 2-D work view that needs only metadata-level reshapes (no copies):
    #   dense slab (8, n/8) when n % 1024 == 0, otherwise (1, n).
    rows = _SUBLANES if (n % _VREG == 0 and n >= _VREG) else 1
    cols = n // rows
    work_shape = (rows, cols)

    # VMEM footprint rounds the sublane dim up to 8, so cap columns by
    # _MAX_TILE_ELEMS / 8 regardless of `rows`.
    block_cols = _pick_block(
        cols,
        align=_LANES,
        max_block=_MAX_TILE_ELEMS // _SUBLANES,
        split_threshold=_SPLIT_THRESHOLD_ELEMS // rows,
    )
    grid = (pl.cdiv(cols, block_cols),)
    spec = pl.BlockSpec((rows, block_cols), lambda i: (0, i))

    # Metadata-only reshapes; natoms reshape == torch.reshape(natoms, target.shape).
    pred_w = jnp.reshape(pred, work_shape)
    target_w = jnp.reshape(target, work_shape)
    natoms_w = jnp.reshape(natoms, work_shape)

    out = pl.pallas_call(
        _per_atom_mae_kernel,
        out_shape=jax.ShapeDtypeStruct(work_shape, out_dtype),
        grid=grid,
        in_specs=[spec, spec, spec],
        out_specs=spec,
        compiler_params=pltpu.CompilerParams(
            dimension_semantics=("parallel",),  # shards blocks across both TCs on v7x
        ),
    )(pred_w, target_w, natoms_w)

    return jnp.reshape(out, target.shape)


def _reference(pred, target, natoms):
    natoms_r = jnp.reshape(natoms, target.shape).astype(jnp.float32)
    return jnp.abs(
        pred.astype(jnp.float32) / natoms_r - target.astype(jnp.float32) / natoms_r
    )


if __name__ == "__main__":
    base = jax.random.PRNGKey(0)
    k1, k2, k3, k4 = jax.random.split(base, 4)

    # N graphs in the batch, one scalar (e.g. energy) per graph.
    N = 8
    pred = jax.random.normal(k1, (N, 1), dtype=jnp.float32) * 10.0
    target = jax.random.normal(k2, (N, 1), dtype=jnp.float32) * 10.0
    natoms = jax.random.randint(k3, (N,), 1, 50).astype(jnp.int32)

    out = jax.block_until_ready(per_atom_mae_loss(pred, target, natoms))
    ref = _reference(pred, target, natoms)
    assert out.shape == target.shape, (out.shape, target.shape)
    assert jnp.allclose(out, ref, rtol=1e-5, atol=1e-6), "mismatch vs reference (N,1)"

    # (N,) 1-D target convention.
    out1d = jax.block_until_ready(per_atom_mae_loss(pred[:, 0], target[:, 0], natoms))
    assert out1d.shape == (N,)
    assert jnp.allclose(out1d, ref[:, 0], rtol=1e-5, atol=1e-6), "mismatch vs reference (N,)"

    # Cover the remaining layout / grid paths (all tiny, run in microseconds).
    def check(n_graphs, key):
        ks = jax.random.split(key, 3)
        p = jax.random.normal(ks[0], (n_graphs,), dtype=jnp.float32) * 5.0
        t = jax.random.normal(ks[1], (n_graphs,), dtype=jnp.float32) * 5.0
        na = jax.random.randint(ks[2], (n_graphs,), 1, 200).astype(jnp.int32)
        o = jax.block_until_ready(per_atom_mae_loss(p, t, na))
        r = _reference(p, t, na)
        assert o.shape == (n_graphs,)
        assert jnp.allclose(o, r, rtol=1e-5, atol=1e-6), f"mismatch vs reference N={n_graphs}"

    kk = jax.random.split(k4, 4)
    check(1000, kk[0])      # ragged N -> (1, N) view, single masked block
    check(4096, kk[1])      # N % 1024 == 0 -> dense (8, 512) slab, single block
    check(70_000, kk[2])    # ragged + large -> (1, N), grid=(2,), partial tail block
    check(131_072, kk[3])   # dense + large -> (8, 16384), grid=(2,) (v7x TC split)

    print("KERNEL_OK")
</pallas_src>

<mosaic_0001>
module attributes {stable_mosaic.version = 11 : i64} {
  func.func @_per_atom_mae_kernel(%arg0: i32, %arg1: memref<1x8xf32, #tpu.memory_space<vmem>>, %arg2: memref<1x8xf32, #tpu.memory_space<vmem>>, %arg3: memref<1x8xi32, #tpu.memory_space<vmem>>, %arg4: memref<1x8xf32, #tpu.memory_space<vmem>>) attributes {dimension_semantics = [#tpu.dimension_semantics<parallel>], iteration_bounds = array<i64: 1>, scalar_prefetch = 0 : i64, scratch_operands = 0 : i64, tpu.core_type = #tpu.core_type<tc>, window_params = [{transform_indices = @transform_0, window_bounds = array<i64: 1, 8>}, {transform_indices = @transform_1, window_bounds = array<i64: 1, 8>}, {transform_indices = @transform_2, window_bounds = array<i64: 1, 8>}, {transform_indices = @transform_3, window_bounds = array<i64: 1, 8>}]} {
    %c0 = arith.constant 0 : index
    %c0_0 = arith.constant 0 : index
    %0 = vector.load %arg1[%c0, %c0_0] : memref<1x8xf32, #tpu.memory_space<vmem>>, vector<1x8xf32>
    %c0_1 = arith.constant 0 : index
    %c0_2 = arith.constant 0 : index
    %1 = vector.load %arg2[%c0_1, %c0_2] : memref<1x8xf32, #tpu.memory_space<vmem>>, vector<1x8xf32>
    %2 = arith.subf %0, %1 : vector<1x8xf32>
    %3 = math.absf %2 : vector<1x8xf32>
    %c0_3 = arith.constant 0 : index
    %c0_4 = arith.constant 0 : index
    %4 = vector.load %arg3[%c0_3, %c0_4] : memref<1x8xi32, #tpu.memory_space<vmem>>, vector<1x8xi32>
    %5 = arith.sitofp %4 : vector<1x8xi32> to vector<1x8xf32>
    %6 = tpu.reciprocal %5 : vector<1x8xf32> -> vector<1x8xf32>
    %7 = arith.mulf %3, %6 : vector<1x8xf32>
    %c0_5 = arith.constant 0 : index
    %c0_6 = arith.constant 0 : index
    %8 = vector.load %arg4[%c0_5, %c0_6] : memref<1x8xf32, #tpu.memory_space<vmem>>, vector<1x8xf32>
    tpu.vector_store %arg4[%c0_5, %c0_6], %7 {strides = array<i32>} : memref<1x8xf32, #tpu.memory_space<vmem>>, vector<1x8xf32>,
    return
  }
  func.func @transform_0(%arg0: i32) -> (i32, i32) {
    %c0_i32 = arith.constant 0 : i32
    %c0_i32_0 = arith.constant 0 : i32
    return %c0_i32, %arg0 : i32, i32
  }
  func.func @transform_1(%arg0: i32) -> (i32, i32) {
    %c0_i32 = arith.constant 0 : i32
    %c0_i32_0 = arith.constant 0 : i32
    return %c0_i32, %arg0 : i32, i32
  }
  func.func @transform_2(%arg0: i32) -> (i32, i32) {
    %c0_i32 = arith.constant 0 : i32
    %c0_i32_0 = arith.constant 0 : i32
    return %c0_i32, %arg0 : i32, i32
  }
  func.func @transform_3(%arg0: i32) -> (i32, i32) {
    %c0_i32 = arith.constant 0 : i32
    %c0_i32_0 = arith.constant 0 : i32
    return %c0_i32, %arg0 : i32, i32
  }
}

</mosaic_0001>

<bundles_post_ra>
// kernel: tpu_custom_call.1
= control target key start
LH: loop header
LB: loop body
LE: loop exit
PB: predicated region body
PF: predicated region fallthrough
CT: control target
= control target key end

     0   :  { %8 = vsyncpa [#allocation3], 0  ;;  %s156_s0 = inlined_call_operand.hbm [shape: f32[1,8], index: 0, kind: input, shape index: {}]   ;;  %s157_s1 = inlined_call_operand.vmem [shape: f32[1,8], index: 1, kind: input, shape index: {}]   ;;  %s158_s2 = inlined_call_operand.vmem [shape: s32[1,8], index: 2, kind: input, shape index: {}]   ;;  %s159_s3 = inlined_call_operand.hbm [shape: f32[1,8], index: 3, kind: output, shape index: {}]  }
   0x1   :  { %9 = vsyncpa [#allocation4], 0  ;;  %s104_s12 = smov [#allocation2]   ;;  %s56_s16 = scalar_lea.hbm %s156_s0, 16 }
   0x2   :  { %s16_s13 = sshll.u32 %s104_s12, 4  ;;  %p57_p0 = scmp.ne.s32.totalorder %s156_s0, %s56_s16  ;;  %s17_s13 = int_to_ptr.vmem [resolvable:$true] %s16_s13 }
   0x3   :  { %p60_p1 = scmp.lt.u32.totalorder %s56_s16, %s156_s0 }
   0x5   :  { %p62_p2 = pnand %p60_p1, %p57_p0 }
   0x7   :  { %65 = shalt.err (!%p62_p2)
}
   0x8   :  { %s66_s21 = scalar_lea.vmem %s17_s13, 16  ;;  %s70_s22 = scalar_lea.vmem %s17_s13, 32 }
   0x9   :  { %p67_p3 = scmp.ne.s32.totalorder %s17_s13, %s66_s21  ;;  %p71_p4 = scmp.lt.s32.totalorder %s17_s13, %s17_s13 }
   0xa   :  { %p72_p5 = scmp.lt.s32.totalorder %s70_s22, %s66_s21 }
   0xc   :  { %p73_p6 = por %p72_p5, %p71_p4 }
   0xe   :  { %p74_p7 = pnand %p73_p6, %p67_p3 }
  0x10   :  { %77 = shalt.err (!%p74_p7)
}
  0x11   :  { %19 = dma.hbm_to_vmem [thread:$0]  %s156_s0, 16, %s17_s13, [#allocation3]  }
  0x12   :  { %100 = dma.done.wait [#allocation3], 16  }
  0x13   :  { %101 = vsyncadd [#allocation3], 4294967280  ;;  %v31_v0 = vld [vmem:[%s158_s2] sm:$0x1]  ;;  %s105_s29 = smov [#allocation5]   ;;  %vm35_vm0 = vcmask 57344  }
  0x14   :  { %v32_v1 = vcvt.s32.f32 %v31_v0  ;;  %v27_v2 = vld [vmem:[#allocation2] sm:$0x1]  ;;  %s43_s30 = sshll.u32 %s105_s29, 4  ;;  %s44_s30 = int_to_ptr.vmem [resolvable:$true] %s43_s30 }
  0x15   :  { %v28_v3 = vld [vmem:[%s157_s1] sm:$0x1]  ;;  %s78_s0 = scalar_lea.vmem %s44_s30, 16  ;;  %s82_s4 = scalar_lea.vmem %s44_s30, 32 }
  0x16   :  { %54 = vrcp.f32 %v32_v1  ;;  %v29_v4 = vsub.f32 %v27_v2, %v28_v3  ;;  %p79_p8 = scmp.ne.s32.totalorder %s44_s30, %s78_s0  ;;  %p83_p9 = scmp.lt.s32.totalorder %s44_s30, %s44_s30 }
  0x17   :  { %p84_p10 = scmp.lt.s32.totalorder %s82_s4, %s78_s0 }
  0x18   :  { %v30_v5 = vand.u32 2147483647, %v29_v4 }
  0x19   :  { %p85_p11 = por %p84_p10, %p83_p9 }
  0x1b   :  { %p86_p12 = pnand %p85_p11, %p79_p8 }
  0x20   :  { %v55_v6 = vpop.eup %54 }
  0x21   :  { %v34_v7 = vmul.f32 %v55_v6, %v30_v5 }
  0x23   :  { %36 = vst.msk [vmem:[#allocation5] sm:$0x1] %vm35_vm0, %v34_v7 }
  0x24   :  { %89 = shalt.err (!%p86_p12)
}
  0x25   :  { %s90_s5 = scalar_lea.hbm %s159_s3, 16 }
  0x26   :  { %p91_p13 = scmp.ne.s32.totalorder %s159_s3, %s90_s5  ;;  %p94_p0 = scmp.lt.u32.totalorder %s90_s5, %s159_s3 }
  0x28   :  { %p96_p1 = pnand %p94_p0, %p91_p13 }
  0x2a   :  { %99 = shalt.err (!%p96_p1)
}
  0x2b   :  { %46 = dma.vmem_to_hbm [thread:$0]  %s44_s30, 16, %s159_s3, [#allocation4]  }
  0x2c   :  { %102 = dma.done.wait [#allocation4], 16  }
  0x2d   :  { %103 = vsyncadd [#allocation4], 4294967280 }
  0x2e   :  { %50 = vsyncpa [#allocation3], 1 }
  0x2f   :  { %51 = vsyncpa [#allocation4], 1 }

</bundles_post_ra>
